<compile_context>
chip_gen: v7x
topology: tpu7x:2x2x1
jax: 0.10.0
libtpu: 0.0.40
codegen_flags: <defaults>
</compile_context>

<pallas_src>
import functools

import jax
import jax.numpy as jnp
from jax.experimental import pallas as pl
from jax.experimental.pallas import tpu as pltpu

HP = 128          # hidden dim padded from 100 to a full lane width
EPS = 1e-5


def _round_up(a, b):
    return ((a + b - 1) // b) * b


def netd_dc_kernel(x_ref, w1_ref, c1_ref, w2_ref, c2_ref, w3_ref, b3_ref, o_ref):
    # Layer 1: cast the f32 x tile to bf16 in-kernel (no extra HBM round trip),
    # (TN,2048)bf16 @ (2048,128)bf16 -> f32 acc, + folded BN shift, ReLU.
    x_bf16 = x_ref[...].astype(jnp.bfloat16)
    h1 = jnp.dot(x_bf16, w1_ref[...], preferred_element_type=jnp.float32)
    h1 = jnp.maximum(h1 + c1_ref[...], 0.0)
    # dropout(training=False) == identity
    # Layer 2: (TN,128) @ (128,128) f32 (tiny), + folded BN shift, ReLU.
    h2 = jnp.dot(h1, w2_ref[...], preferred_element_type=jnp.float32)
    h2 = jnp.maximum(h2 + c2_ref[...], 0.0)
    # Layer 3: (TN,128) @ (128,2) + bias.
    o_ref[...] = (jnp.dot(h2, w3_ref[...], preferred_element_type=jnp.float32)
                  + b3_ref[...])


def _fold_and_pad_params(params):
    """Fold eval-mode BN into the linear weights/biases and pad hidden dim to HP."""
    (w1, b1, g1, be1, m1, v1,
     w2, b2, g2, be2, m2, v2,
     w3, b3) = params

    a1 = g1 / jnp.sqrt(v1 + EPS)                 # (100,)
    c1 = (b1 - m1) * a1 + be1                    # (100,)
    a2 = g2 / jnp.sqrt(v2 + EPS)
    c2 = (b2 - m2) * a2 + be2

    w1f = w1 * a1[None, :]                       # (2048, 100) BN scale folded in
    w2f = w2 * a2[None, :]                       # (100, 100)

    # Zero-pad hidden dim 100 -> 128. Padded lanes stay exactly zero through
    # bias+ReLU (0*w + 0 -> relu -> 0) and contribute nothing to later matmuls.
    w1p = jnp.zeros((2048, HP), jnp.float32).at[:, :100].set(w1f).astype(jnp.bfloat16)
    c1p = jnp.zeros((1, HP), jnp.float32).at[0, :100].set(c1)
    w2p = jnp.zeros((HP, HP), jnp.float32).at[:100, :100].set(w2f)
    c2p = jnp.zeros((1, HP), jnp.float32).at[0, :100].set(c2)
    w3p = jnp.zeros((HP, 2), jnp.float32).at[:100, :].set(w3)
    b3r = b3.reshape(1, 2)
    return w1p, c1p, w2p, c2p, w3p, b3r


@functools.partial(jax.jit, static_argnames=("tn",))
def netd_dc_forward(x, params, *, tn=1024):
    """x: (N, 2048) float32 -> (N, 2) float32 (eval-mode netD_dc)."""
    w1p, c1p, w2p, c2p, w3p, b3r = _fold_and_pad_params(params)

    n = x.shape[0]
    # Keep the tile a multiple of 8 rows (f32 sublane) and, when possible, keep
    # at least 2 grid steps so the "parallel" batch axis can be sharded across
    # v7x's 2 TensorCores (also balances the last ragged tile).
    tn = max(8, min(tn, _round_up((n + 1) // 2, 8)))
    grid = (pl.cdiv(n, tn),)          # ragged last tile; no batch padding

    flops = 2 * grid[0] * tn * (2048 * HP + HP * HP + HP * 2)
    bytes_accessed = (n * 2048 * 4                # x (f32, streamed once)
                      + 2048 * HP * 2             # w1 (bf16, VMEM-resident)
                      + (HP * HP + HP * 2 + 2 * HP + 2) * 4
                      + n * 2 * 4)                # output

    out = pl.pallas_call(
        netd_dc_kernel,
        out_shape=jax.ShapeDtypeStruct((n, 2), jnp.float32),
        grid=grid,
        in_specs=[
            pl.BlockSpec((tn, 2048), lambda i: (i, 0)),   # streamed x tile (f32)
            pl.BlockSpec((2048, HP), lambda i: (0, 0)),   # resident weights /
            pl.BlockSpec((1, HP),   lambda i: (0, 0)),    # per-feature consts
            pl.BlockSpec((HP, HP),  lambda i: (0, 0)),
            pl.BlockSpec((1, HP),   lambda i: (0, 0)),
            pl.BlockSpec((HP, 2),   lambda i: (0, 0)),
            pl.BlockSpec((1, 2),    lambda i: (0, 0)),
        ],
        out_specs=pl.BlockSpec((tn, 2), lambda i: (i, 0)),
        compiler_params=pltpu.CompilerParams(
            dimension_semantics=("parallel",),
            vmem_limit_bytes=40 * 1024 * 1024),
        cost_estimate=pl.CostEstimate(
            flops=flops, transcendentals=0, bytes_accessed=bytes_accessed),
    )(x, w1p, c1p, w2p, c2p, w3p, b3r)
    return out


def init_params(key):
    """Deterministic init matching the shapes of netD_dc.__init__."""
    ks = jax.random.split(key, 6)

    def linear_init(kw, kb, fan_in, fan_out):
        bound = 1.0 / jnp.sqrt(fan_in)
        # Weight stored as (fan_in, fan_out) so the kernel does x @ W directly.
        w = jax.random.uniform(kw, (fan_in, fan_out), jnp.float32, -bound, bound)
        b = jax.random.uniform(kb, (fan_out,), jnp.float32, -bound, bound)
        return w, b

    w1, b1 = linear_init(ks[0], ks[1], 2048, 100)
    w2, b2 = linear_init(ks[2], ks[3], 100, 100)
    w3, b3 = linear_init(ks[4], ks[5], 100, 2)

    # BatchNorm1d fresh-init parameters / running stats.
    g1, be1 = jnp.ones((100,), jnp.float32), jnp.zeros((100,), jnp.float32)
    m1, v1 = jnp.zeros((100,), jnp.float32), jnp.ones((100,), jnp.float32)
    g2, be2 = jnp.ones((100,), jnp.float32), jnp.zeros((100,), jnp.float32)
    m2, v2 = jnp.zeros((100,), jnp.float32), jnp.ones((100,), jnp.float32)

    return (w1, b1, g1, be1, m1, v1,
            w2, b2, g2, be2, m2, v2,
            w3, b3)


if __name__ == "__main__":
    key = jax.random.PRNGKey(0)
    k_x, k_p = jax.random.split(key)

    N = 16  # small batch (feature dim 2048 is fixed by the module)
    x = jax.random.normal(k_x, (N, 2048), dtype=jnp.float32)
    params = init_params(k_p)

    out = netd_dc_forward(x, params)
    out = jax.block_until_ready(out)
    assert out.shape == (N, 2)

    (w1, b1, g1, be1, m1, v1, w2, b2, g2, be2, m2, v2, w3, b3) = params

    # Reference 1: numerics matched to the kernel (bf16 first layer, f32 acc,
    # BN folded the same way) -> tight tolerance.
    a1 = g1 / jnp.sqrt(v1 + EPS); c1 = (b1 - m1) * a1 + be1
    a2 = g2 / jnp.sqrt(v2 + EPS); c2 = (b2 - m2) * a2 + be2
    h = jnp.dot(x.astype(jnp.bfloat16), (w1 * a1[None, :]).astype(jnp.bfloat16),
                preferred_element_type=jnp.float32)
    h = jnp.maximum(h + c1, 0.0)
    h = jnp.maximum(h @ (w2 * a2[None, :]) + c2, 0.0)
    ref_matched = h @ w3 + b3
    assert jnp.allclose(out, ref_matched, atol=2e-3, rtol=2e-3), (
        float(jnp.max(jnp.abs(out - ref_matched))))

    # Reference 2: pure f32 eval-mode forward (sanity check on semantics;
    # loose tolerance covers the in-kernel bf16 cast of x / w1).
    hf = jnp.maximum((x @ w1 + b1 - m1) / jnp.sqrt(v1 + EPS) * g1 + be1, 0.0)
    hf = jnp.maximum((hf @ w2 + b2 - m2) / jnp.sqrt(v2 + EPS) * g2 + be2, 0.0)
    ref_f32 = hf @ w3 + b3
    assert jnp.allclose(out, ref_f32, atol=3e-2, rtol=3e-2), (
        float(jnp.max(jnp.abs(out - ref_f32))))

    print("KERNEL_OK")
</pallas_src>

<mosaic_0001>
module attributes {stable_mosaic.version = 11 : i64} {
  func.func @netd_dc_kernel(%arg0: i32, %arg1: memref<8x2048xf32, #tpu.memory_space<vmem>>, %arg2: memref<2048x128xbf16, #tpu.memory_space<vmem>>, %arg3: memref<1x128xf32, #tpu.memory_space<vmem>>, %arg4: memref<128x128xf32, #tpu.memory_space<vmem>>, %arg5: memref<1x128xf32, #tpu.memory_space<vmem>>, %arg6: memref<128x2xf32, #tpu.memory_space<vmem>>, %arg7: memref<1x2xf32, #tpu.memory_space<vmem>>, %arg8: memref<8x2xf32, #tpu.memory_space<vmem>>) attributes {dimension_semantics = [#tpu.dimension_semantics<parallel>], iteration_bounds = array<i64: 2>, scalar_prefetch = 0 : i64, scratch_operands = 0 : i64, tpu.core_type = #tpu.core_type<tc>, window_params = [{transform_indices = @transform_0, window_bounds = array<i64: 8, 2048>}, {pipeline_mode = #tpu.pipeline_mode<synchronous>, transform_indices = @transform_1, window_bounds = array<i64: 2048, 128>}, {pipeline_mode = #tpu.pipeline_mode<synchronous>, transform_indices = @transform_2, window_bounds = array<i64: 1, 128>}, {pipeline_mode = #tpu.pipeline_mode<synchronous>, transform_indices = @transform_3, window_bounds = array<i64: 128, 128>}, {pipeline_mode = #tpu.pipeline_mode<synchronous>, transform_indices = @transform_4, window_bounds = array<i64: 1, 128>}, {pipeline_mode = #tpu.pipeline_mode<synchronous>, transform_indices = @transform_5, window_bounds = array<i64: 128, 2>}, {pipeline_mode = #tpu.pipeline_mode<synchronous>, transform_indices = @transform_6, window_bounds = array<i64: 1, 2>}, {transform_indices = @transform_7, window_bounds = array<i64: 8, 2>}]} {
    %c0 = arith.constant 0 : index
    %c0_0 = arith.constant 0 : index
    %0 = vector.load %arg1[%c0, %c0_0] : memref<8x2048xf32, #tpu.memory_space<vmem>>, vector<8x2048xf32>
    %1 = arith.truncf %0 : vector<8x2048xf32> to vector<8x2048xbf16>
    %c0_1 = arith.constant 0 : index
    %c0_2 = arith.constant 0 : index
    %2 = vector.load %arg2[%c0_1, %c0_2] : memref<2048x128xbf16, #tpu.memory_space<vmem>>, vector<2048x128xbf16>
    %cst = arith.constant dense<0.000000e+00> : vector<8x128xf32>
    %3 = tpu.matmul %1, %2, %cst {dimension_numbers = #tpu.dot_dimension_numbers<[1], [0], [0], [1], [0, 0, 1, 1], [], []>} : vector<8x2048xbf16>, vector<2048x128xbf16>, vector<8x128xf32> -> vector<8x128xf32>
    %c0_3 = arith.constant 0 : index
    %c0_4 = arith.constant 0 : index
    %4 = vector.load %arg3[%c0_3, %c0_4] : memref<1x128xf32, #tpu.memory_space<vmem>>, vector<1x128xf32>
    %5 = vector.broadcast %4 : vector<1x128xf32> to vector<8x128xf32>
    %6 = arith.addf %3, %5 : vector<8x128xf32>
    %cst_5 = arith.constant 0.000000e+00 : f32
    %7 = vector.broadcast %cst_5 : f32 to vector<8x128xf32>
    %8 = arith.maximumf %6, %7 : vector<8x128xf32>
    %c0_6 = arith.constant 0 : index
    %c0_7 = arith.constant 0 : index
    %9 = vector.load %arg4[%c0_6, %c0_7] : memref<128x128xf32, #tpu.memory_space<vmem>>, vector<128x128xf32>
    %cst_8 = arith.constant dense<0.000000e+00> : vector<8x128xf32>
    %10 = tpu.matmul %8, %9, %cst_8 {dimension_numbers = #tpu.dot_dimension_numbers<[1], [0], [0], [1], [0, 0, 1, 1], [], []>} : vector<8x128xf32>, vector<128x128xf32>, vector<8x128xf32> -> vector<8x128xf32>
    %c0_9 = arith.constant 0 : index
    %c0_10 = arith.constant 0 : index
    %11 = vector.load %arg5[%c0_9, %c0_10] : memref<1x128xf32, #tpu.memory_space<vmem>>, vector<1x128xf32>
    %12 = vector.broadcast %11 : vector<1x128xf32> to vector<8x128xf32>
    %13 = arith.addf %10, %12 : vector<8x128xf32>
    %cst_11 = arith.constant 0.000000e+00 : f32
    %14 = vector.broadcast %cst_11 : f32 to vector<8x128xf32>
    %15 = arith.maximumf %13, %14 : vector<8x128xf32>
    %c0_12 = arith.constant 0 : index
    %c0_13 = arith.constant 0 : index
    %16 = vector.load %arg6[%c0_12, %c0_13] : memref<128x2xf32, #tpu.memory_space<vmem>>, vector<128x2xf32>
    %cst_14 = arith.constant dense<0.000000e+00> : vector<8x2xf32>
    %17 = tpu.matmul %15, %16, %cst_14 {dimension_numbers = #tpu.dot_dimension_numbers<[1], [0], [0], [1], [0, 0, 1, 1], [], []>} : vector<8x128xf32>, vector<128x2xf32>, vector<8x2xf32> -> vector<8x2xf32>
    %c0_15 = arith.constant 0 : index
    %c0_16 = arith.constant 0 : index
    %18 = vector.load %arg7[%c0_15, %c0_16] : memref<1x2xf32, #tpu.memory_space<vmem>>, vector<1x2xf32>
    %19 = vector.broadcast %18 : vector<1x2xf32> to vector<8x2xf32>
    %20 = arith.addf %17, %19 : vector<8x2xf32>
    %c0_17 = arith.constant 0 : index
    %c0_18 = arith.constant 0 : index
    %21 = vector.load %arg8[%c0_17, %c0_18] : memref<8x2xf32, #tpu.memory_space<vmem>>, vector<8x2xf32>
    tpu.vector_store %arg8[%c0_17, %c0_18], %20 {strides = array<i32>} : memref<8x2xf32, #tpu.memory_space<vmem>>, vector<8x2xf32>,
    return
  }
  func.func @transform_0(%arg0: i32) -> (i32, i32) {
    %c0_i32 = arith.constant 0 : i32
    %c0_i32_0 = arith.constant 0 : i32
    return %arg0, %c0_i32 : i32, i32
  }
  func.func @transform_1(%arg0: i32) -> (i32, i32) {
    %c0_i32 = arith.constant 0 : i32
    %c0_i32_0 = arith.constant 0 : i32
    %c0_i32_1 = arith.constant 0 : i32
    return %c0_i32, %c0_i32_0 : i32, i32
  }
  func.func @transform_2(%arg0: i32) -> (i32, i32) {
    %c0_i32 = arith.constant 0 : i32
    %c0_i32_0 = arith.constant 0 : i32
    %c0_i32_1 = arith.constant 0 : i32
    return %c0_i32, %c0_i32_0 : i32, i32
  }
  func.func @transform_3(%arg0: i32) -> (i32, i32) {
    %c0_i32 = arith.constant 0 : i32
    %c0_i32_0 = arith.constant 0 : i32
    %c0_i32_1 = arith.constant 0 : i32
    return %c0_i32, %c0_i32_0 : i32, i32
  }
  func.func @transform_4(%arg0: i32) -> (i32, i32) {
    %c0_i32 = arith.constant 0 : i32
    %c0_i32_0 = arith.constant 0 : i32
    %c0_i32_1 = arith.constant 0 : i32
    return %c0_i32, %c0_i32_0 : i32, i32
  }
  func.func @transform_5(%arg0: i32) -> (i32, i32) {
    %c0_i32 = arith.constant 0 : i32
    %c0_i32_0 = arith.constant 0 : i32
    %c0_i32_1 = arith.constant 0 : i32
    return %c0_i32, %c0_i32_0 : i32, i32
  }
  func.func @transform_6(%arg0: i32) -> (i32, i32) {
    %c0_i32 = arith.constant 0 : i32
    %c0_i32_0 = arith.constant 0 : i32
    %c0_i32_1 = arith.constant 0 : i32
    return %c0_i32, %c0_i32_0 : i32, i32
  }
  func.func @transform_7(%arg0: i32) -> (i32, i32) {
    %c0_i32 = arith.constant 0 : i32
    %c0_i32_0 = arith.constant 0 : i32
    return %arg0, %c0_i32 : i32, i32
  }
}

</mosaic_0001>

<bundles_post_ra>
// kernel: netd_dc_forward.1
= control target key start
LH: loop header
LB: loop body
LE: loop exit
PB: predicated region body
PF: predicated region fallthrough
CT: control target
= control target key end

     0   :  { %s2564_s24 = smov 0   ;;  %s3112_s0 = inlined_call_operand.vmem [shape: f32[16,2048], index: 0, kind: input, shape index: {}]   ;;  %s3113_s1 = inlined_call_operand.vmem [shape: bf16[2048,128], index: 1, kind: input, shape index: {}]   ;;  %s3114_s2 = inlined_call_operand.vmem [shape: f32[1,128], index: 2, kind: input, shape index: {}]   ;;  %s3115_s3 = inlined_call_operand.vmem [shape: f32[128,128], index: 3, kind: input, shape index: {}]   ;;  %s3116_s4 = inlined_call_operand.vmem [shape: f32[1,128], index: 4, kind: input, shape index: {}]   ;;  %s3117_s5 = inlined_call_operand.vmem [shape: f32[128,2], index: 5, kind: input, shape index: {}]   ;;  %s3118_s6 = inlined_call_operand.vmem [shape: f32[1,2], index: 6, kind: input, shape index: {}]   ;;  %s3119_s7 = inlined_call_operand.vmem [shape: f32[16,2], index: 7, kind: output, shape index: {}]  }
   0x1 LB: > { %s1904_s25 = sadd.s32 4294967295, %s2519_s24   ;;  %p1908_p0 = scmp.ge.s32.totalorder %s2519_s24, 1  ;;  %s2519_s24 = sphi %s2564_s24, %s17_s24  }
   0x2   : > { %p237_p1 = scmp.lt.s32.totalorder %s2519_s24, 3 }
   0x4   : > { %p238_p2 = pnand %p1908_p0, %p237_p1 }
   0x5   : > { %v2385_v0 = vld [vmem:[%s3113_s1 + $0x40] sm:$0xff] (!%p238_p2)   ;;  %v2389_v4 = vld [vmem:[%s3113_s1 + $0x48] sm:$0xff] (!%p238_p2)   ;;  %v2393_v8 = vld [vmem:[%s3113_s1 + $0x50] sm:$0xff] (!%p238_p2)   ;;  %p268_p3 = scmp.lt.s32.totalorder (!%p238_p2), %s1904_s25, 1  ;;  %vm2522_vm0 = vmmov (!%p238_p2), 0   ;;  %vm1849_vm1 = vcmask (!%p238_p2), 15360  }
   0x6   : > { %241 = sbr.rel (%p238_p2) target bundleno = 787 (0x313), region = 48  ;;  %v2386_v1 = vld [vmem:[%s3113_s1 + $0xc0] sm:$0xff] (!%p238_p2)   ;;  %2046 = vmatprep.subr.bf16.mxu0 (!%p238_p2), %v2385_v0  ;;  %v2390_v5 = vld [vmem:[%s3113_s1 + $0xc8] sm:$0xff] (!%p238_p2)   ;;  %v2394_v9 = vld [vmem:[%s3113_s1 + $0xd0] sm:$0xff] (!%p238_p2)  }
   0x7   : > { %v2387_v2 = vld [vmem:[%s3113_s1] sm:$0xff] (!%p238_p2)   ;;  %2068 = vmatprep.subr.bf16.mxu1 (!%p238_p2), %v2386_v1  ;;  %v2391_v6 = vld [vmem:[%s3113_s1 + $0x8] sm:$0xff] (!%p238_p2)   ;;  %v2395_v10 = vld [vmem:[%s3113_s1 + $0x10] sm:$0xff] (!%p238_p2)  }
   0x8   : > { %v2388_v3 = vld [vmem:[%s3113_s1 + $0x80] sm:$0xff] (!%p238_p2)   ;;  %2047 = vmatpush3.bf16.msra.mxu0 (!%p238_p2), %v2387_v2  ;;  %v2392_v7 = vld [vmem:[%s3113_s1 + $0x88] sm:$0xff] (!%p238_p2)   ;;  %v2396_v11 = vld [vmem:[%s3113_s1 + $0x90] sm:$0xff] (!%p238_p2)  }
   0x9   : > { %2069 = vmatpush3.bf16.msra.mxu1 (!%p238_p2), %v2388_v3  ;;  %2048 = vmatprep.subr.bf16.mxu0 (!%p238_p2), %v2389_v4  ;;  %v2397_v12 = vld [vmem:[%s3113_s1 + $0x58] sm:$0xff] (!%p238_p2)   ;;  %v2401_v16 = vld [vmem:[%s3113_s1 + $0x60] sm:$0xff] (!%p238_p2)   ;;  %v2405_v20 = vld [vmem:[%s3113_s1 + $0x68] sm:$0xff] (!%p238_p2)  }
   0xa   : > { %2070 = vmatprep.subr.bf16.mxu1 (!%p238_p2), %v2390_v5  ;;  %v2398_v13 = vld [vmem:[%s3113_s1 + $0xd8] sm:$0xff] (!%p238_p2)   ;;  %v2402_v17 = vld [vmem:[%s3113_s1 + $0xe0] sm:$0xff] (!%p238_p2)   ;;  %v2406_v21 = vld [vmem:[%s3113_s1 + $0xe8] sm:$0xff] (!%p238_p2)  }
   0xb   : > { %v2399_v14 = vld [vmem:[%s3113_s1 + $0x18] sm:$0xff] (!%p238_p2)   ;;  %v2403_v18 = vld [vmem:[%s3113_s1 + $0x20] sm:$0xff] (!%p238_p2)   ;;  %v2407_v22 = vld [vmem:[%s3113_s1 + $0x28] sm:$0xff] (!%p238_p2)  }
   0xc   : > { %2049 = vmatpush3.bf16.msra.mxu0 (!%p238_p2), %v2391_v6  ;;  %v2400_v15 = vld [vmem:[%s3113_s1 + $0x98] sm:$0xff] (!%p238_p2)   ;;  %v2404_v19 = vld [vmem:[%s3113_s1 + $0xa0] sm:$0xff] (!%p238_p2)   ;;  %v2408_v23 = vld [vmem:[%s3113_s1 + $0xa8] sm:$0xff] (!%p238_p2)  }
   0xd   : > { %2071 = vmatpush3.bf16.msra.mxu1 %v2392_v7  ;;  %2050 = vmatprep.subr.bf16.mxu0 %v2393_v8  ;;  %s3121_s25 = smov (!%p268_p3, %s1904_s25), 1  ;;  %v2409_v24 = vld [vmem:[%s3113_s1 + $0x70] sm:$0xff]   ;;  %v2413_v28 = vld [vmem:[%s3113_s1 + $0x78] sm:$0xff]   ;;  %v2417_v40 = vld [vmem:[%s3113_s1 + $0x140] sm:$0xff]  }
   0xe   : > { %2072 = vmatprep.subr.bf16.mxu1 %v2394_v9  ;;  %v2410_v25 = vld [vmem:[%s3113_s1 + $0xf0] sm:$0xff]   ;;  %s2045_s15 = sshll.u32 %s3121_s25, 7  ;;  %v2414_v29 = vld [vmem:[%s3113_s1 + $0xf8] sm:$0xff]   ;;  %v2418_v41 = vld [vmem:[%s3113_s1 + $0x1c0] sm:$0xff]   ;;  %s1911_s28 = sshll.u32 %s3121_s25, 3 }
   0xf   : > { %v2411_v26 = vld [vmem:[%s3113_s1 + $0x30] sm:$0xff]   ;;  %s2672_s26 = scalar_lea.vmem %s3112_s0, %s2045_s15  ;;  %v2415_v30 = vld [vmem:[%s3113_s1 + $0x38] sm:$0xff]   ;;  %v2419_v42 = vld [vmem:[%s3113_s1 + $0x100] sm:$0xff]   ;;  %s276_s9 = scalar_lea.vmem %s3119_s7, %s1911_s28 }
  0x10   : > { %2051 = vmatpush3.bf16.msra.mxu0 %v2395_v10  ;;  %v2412_v27 = vld [vmem:[%s3113_s1 + $0xb0] sm:$0xff]   ;;  %v2416_v31 = vld [vmem:[%s3113_s1 + $0xb8] sm:$0xff]   ;;  %v279_v32 = vld [vmem:[%s2672_s26 + $0x8] sm:$0xff] }
  0x11   : > { %2073 = vmatpush3.bf16.msra.mxu1 %v2396_v11  ;;  %2052 = vmatprep.subr.bf16.mxu0 %v2397_v12  ;;  %v281_v33 = vld [vmem:[%s2672_s26 + $0x18] sm:$0xff]  ;;  %v278_v34 = vld [vmem:[%s2672_s26] sm:$0xff]  ;;  %v295_v35 = vpack.c.bf16 %v279_v32, %v279_v32  ;;  %v280_v38 = vld [vmem:[%s2672_s26 + $0x10] sm:$0xff] }
  0x12   : > { %2074 = vmatprep.subr.bf16.mxu1 %v2398_v13  ;;  %v297_v36 = vpack.c.bf16 %v281_v33, %v281_v33  ;;  %v294_v37 = vpack.c.bf16 %v278_v34, %v278_v34  ;;  %v296_v39 = vpack.c.bf16 %v280_v38, %v280_v38  ;;  %v2420_v43 = vld [vmem:[%s3113_s1 + $0x180] sm:$0xff]   ;;  %v2421_v44 = vld [vmem:[%s3113_s1 + $0x148] sm:$0xff]   ;;  %v2425_v48 = vld [vmem:[%s3113_s1 + $0x150] sm:$0xff]  }
  0x13   : > { %1373 = vmatprep.mubr.bf16.mxu0 %v295_v35  ;;  %v2422_v45 = vld [vmem:[%s3113_s1 + $0x1c8] sm:$0xff]   ;;  %v2426_v49 = vld [vmem:[%s3113_s1 + $0x1d0] sm:$0xff]   ;;  %v2429_v52 = vld [vmem:[%s3113_s1 + $0x158] sm:$0xff]  }
  0x14   : > { %2053 = vmatpush3.bf16.msra.mxu0 %v2399_v14  ;;  %1413 = vmatprep.mubr.bf16.mxu1 %v297_v36  ;;  %v2423_v46 = vld [vmem:[%s3113_s1 + $0x108] sm:$0xff]   ;;  %v2427_v50 = vld [vmem:[%s3113_s1 + $0x110] sm:$0xff]   ;;  %v2430_v53 = vld [vmem:[%s3113_s1 + $0x1d8] sm:$0xff]  }
  0x15   : > { %2075 = vmatpush3.bf16.msra.mxu1 %v2400_v15  ;;  %2054 = vmatprep.subr.bf16.mxu0 %v2401_v16  ;;  %v2424_v47 = vld [vmem:[%s3113_s1 + $0x188] sm:$0xff]   ;;  %v2428_v51 = vld [vmem:[%s3113_s1 + $0x190] sm:$0xff]   ;;  %v2431_v54 = vld [vmem:[%s3113_s1 + $0x118] sm:$0xff]  }
  0x16   : > { %2076 = vmatprep.subr.bf16.mxu1 %v2402_v17  ;;  %v2432_v55 = vld [vmem:[%s3113_s1 + $0x198] sm:$0xff]   ;;  %v2433_v56 = vld [vmem:[%s3113_s1 + $0x160] sm:$0xff]   ;;  %v2437_v60 = vld [vmem:[%s3113_s1 + $0x168] sm:$0xff]  }
  0x17   : > { %v2434_v57 = vld [vmem:[%s3113_s1 + $0x1e0] sm:$0xff]   ;;  %v2438_v61 = vld [vmem:[%s3113_s1 + $0x1e8] sm:$0xff]   ;;  %v2441_v0 = vld [vmem:[%s3113_s1 + $0x170] sm:$0xff]  }
  0x18   : > { %2055 = vmatpush3.bf16.msra.mxu0 %v2403_v18  ;;  %v2435_v58 = vld [vmem:[%s3113_s1 + $0x120] sm:$0xff]   ;;  %v2439_v62 = vld [vmem:[%s3113_s1 + $0x128] sm:$0xff]   ;;  %v2442_v1 = vld [vmem:[%s3113_s1 + $0x1f0] sm:$0xff]  }
  0x19   : > { %2077 = vmatpush3.bf16.msra.mxu1 %v2404_v19  ;;  %2056 = vmatprep.subr.bf16.mxu0 %v2405_v20  ;;  %v2436_v59 = vld [vmem:[%s3113_s1 + $0x1a0] sm:$0xff]   ;;  %v2440_v63 = vld [vmem:[%s3113_s1 + $0x1a8] sm:$0xff]   ;;  %v2443_v2 = vld [vmem:[%s3113_s1 + $0x130] sm:$0xff]  }
  0x1a   : > { %2078 = vmatprep.subr.bf16.mxu1 %v2406_v21  ;;  %v2444_v3 = vld [vmem:[%s3113_s1 + $0x1b0] sm:$0xff]   ;;  %v2445_v4 = vld [vmem:[%s3113_s1 + $0x178] sm:$0xff]   ;;  %v283_v8 = vld [vmem:[%s2672_s26 + $0x28] sm:$0xff] }
  0x1b   : > { %v2446_v5 = vld [vmem:[%s3113_s1 + $0x1f8] sm:$0xff]   ;;  %v299_v10 = vpack.c.bf16 %v283_v8, %v283_v8  ;;  %v282_v12 = vld [vmem:[%s2672_s26 + $0x20] sm:$0xff]  ;;  %v284_v13 = vld [vmem:[%s2672_s26 + $0x30] sm:$0xff] }
  0x1c   : > { %2057 = vmatpush3.bf16.msra.mxu0 %v2407_v22  ;;  %v2447_v6 = vld [vmem:[%s3113_s1 + $0x138] sm:$0xff]   ;;  %v298_v14 = vpack.c.bf16 %v282_v12, %v282_v12  ;;  %v300_v15 = vpack.c.bf16 %v284_v13, %v284_v13  ;;  %v2449_v16 = vld [vmem:[%s3113_s1 + $0x240] sm:$0xff]   ;;  %v2453_v20 = vld [vmem:[%s3113_s1 + $0x248] sm:$0xff]  }
  0x1d   : > { %2079 = vmatpush3.bf16.msra.mxu1 %v2408_v23  ;;  %2058 = vmatprep.subr.bf16.mxu0 %v2409_v24  ;;  %v2448_v7 = vld [vmem:[%s3113_s1 + $0x1b8] sm:$0xff]   ;;  %v2450_v17 = vld [vmem:[%s3113_s1 + $0x2c0] sm:$0xff]   ;;  %v2454_v21 = vld [vmem:[%s3113_s1 + $0x2c8] sm:$0xff]  }
  0x1e   : > { %2080 = vmatprep.subr.bf16.mxu1 %v2410_v25  ;;  %v285_v9 = vld [vmem:[%s2672_s26 + $0x38] sm:$0xff]  ;;  %v2451_v18 = vld [vmem:[%s3113_s1 + $0x200] sm:$0xff]   ;;  %v2455_v22 = vld [vmem:[%s3113_s1 + $0x208] sm:$0xff]  }
  0x1f   : > { %v301_v11 = vpack.c.bf16 %v285_v9, %v285_v9  ;;  %v2452_v19 = vld [vmem:[%s3113_s1 + $0x280] sm:$0xff]   ;;  %v2456_v23 = vld [vmem:[%s3113_s1 + $0x288] sm:$0xff]   ;;  %v2457_v24 = vld [vmem:[%s3113_s1 + $0x250] sm:$0xff]  }
  0x20   : > { %2059 = vmatpush3.bf16.msra.mxu0 %v2411_v26  ;;  %v2458_v25 = vld [vmem:[%s3113_s1 + $0x2d0] sm:$0xff]   ;;  %v2465_v32 = vld [vmem:[%s3113_s1 + $0x260] sm:$0xff]   ;;  %v2469_v36 = vld [vmem:[%s3113_s1 + $0x268] sm:$0xff]  }
  0x21   : > { %2081 = vmatpush3.bf16.msra.mxu1 %v2412_v27  ;;  %2060 = vmatprep.subr.bf16.mxu0 %v2413_v28  ;;  %v2459_v26 = vld [vmem:[%s3113_s1 + $0x210] sm:$0xff]   ;;  %v2461_v28 = vld [vmem:[%s3113_s1 + $0x258] sm:$0xff]   ;;  %v2466_v33 = vld [vmem:[%s3113_s1 + $0x2e0] sm:$0xff]  }
  0x22   : > { %2082 = vmatprep.subr.bf16.mxu1 %v2414_v29  ;;  %v2460_v27 = vld [vmem:[%s3113_s1 + $0x290] sm:$0xff]   ;;  %v2462_v29 = vld [vmem:[%s3113_s1 + $0x2d8] sm:$0xff]   ;;  %v2467_v34 = vld [vmem:[%s3113_s1 + $0x220] sm:$0xff]  }
  0x23   : > { %v2468_v35 = vld [vmem:[%s3113_s1 + $0x2a0] sm:$0xff]   ;;  %v2471_v38 = vld [vmem:[%s3113_s1 + $0x228] sm:$0xff]  }
  0x24   : > { %2061 = vmatpush3.bf16.msra.mxu0 %v2415_v30  ;;  %v2463_v30 = vld [vmem:[%s3113_s1 + $0x218] sm:$0xff]   ;;  %v2497_v8 = vld [vmem:[%s3113_s1 + $0x360] sm:$0xff]   ;;  %v2501_v12 = vld [vmem:[%s3113_s1 + $0x368] sm:$0xff]  }
  0x25   : > { %2083 = vmatpush3.bf16.msra.mxu1 %v2416_v31  ;;  %2090 = vmatprep.subr.bf16.mxu0 %v2417_v40  ;;  %v2464_v31 = vld [vmem:[%s3113_s1 + $0x298] sm:$0xff]   ;;  %v2473_v40 = vld [vmem:[%s3113_s1 + $0x270] sm:$0xff]   ;;  %v2498_v9 = vld [vmem:[%s3113_s1 + $0x3e0] sm:$0xff]  }
  0x26   : > { %2112 = vmatprep.subr.bf16.mxu1 %v2418_v41  ;;  %v2474_v41 = vld [vmem:[%s3113_s1 + $0x2f0] sm:$0xff]   ;;  %v2502_v13 = vld [vmem:[%s3113_s1 + $0x3e8] sm:$0xff]  }
  0x27   : > { %1374 = vmatmul.mubr.bf16.vlgmr.msra.gmra.mrb[0].mxu0 %v294_v37  ;;  %v2470_v37 = vld [vmem:[%s3113_s1 + $0x2e8] sm:$0xff]  }
  0x28   : > { %1414 = vmatmul.mubr.bf16.vlgmr.msra.gmra.mrb[0].mxu1 %v296_v39  ;;  %2091 = vmatpush3.bf16.msra.mxu0 %v2419_v42  ;;  %v2472_v39 = vld [vmem:[%s3113_s1 + $0x2a8] sm:$0xff]   ;;  %v2475_v42 = vld [vmem:[%s3113_s1 + $0x230] sm:$0xff]  }
  0x29   : > { %2113 = vmatpush3.bf16.msra.mxu1 %v2420_v43  ;;  %2092 = vmatprep.subr.bf16.mxu0 %v2421_v44  ;;  %v2476_v43 = vld [vmem:[%s3113_s1 + $0x2b0] sm:$0xff]   ;;  %v2477_v44 = vld [vmem:[%s3113_s1 + $0x278] sm:$0xff]  }
  0x2a   : > { %2114 = vmatprep.subr.bf16.mxu1 %v2422_v45  ;;  %1453 = vmatprep.mubr.bf16.mxu0 %v299_v10  ;;  %v2478_v45 = vld [vmem:[%s3113_s1 + $0x2f8] sm:$0xff]   ;;  %v2499_v10 = vld [vmem:[%s3113_s1 + $0x320] sm:$0xff]  }
  0x2b   : > { %1493 = vmatprep.mubr.bf16.mxu1 %v301_v11  ;;  %v2500_v11 = vld [vmem:[%s3113_s1 + $0x3a0] sm:$0xff]  }
  0x2c   : > { %2093 = vmatpush3.bf16.msra.mxu0 %v2423_v46  ;;  %v2479_v46 = vld [vmem:[%s3113_s1 + $0x238] sm:$0xff]  }
  0x2d   : > { %2115 = vmatpush3.bf16.msra.mxu1 %v2424_v47  ;;  %2094 = vmatprep.subr.bf16.mxu0 %v2425_v48  ;;  %v2480_v47 = vld [vmem:[%s3113_s1 + $0x2b8] sm:$0xff]   ;;  %v287_v48 = vld [vmem:[%s2672_s26 + $0x48] sm:$0xff] }
  0x2e   : > { %2116 = vmatprep.subr.bf16.mxu1 %v2426_v49  ;;  %v303_v49 = vpack.c.bf16 %v287_v48, %v287_v48  ;;  %v1672_v48 = vld [vmem:[%s3115_s3 + $0x50] sm:$0xff] }
  0x30   : > { %2095 = vmatpush3.bf16.msra.mxu0 %v2427_v50  ;;  %v289_v50 = vld [vmem:[%s2672_s26 + $0x58] sm:$0xff] }
  0x31   : > { %2117 = vmatpush3.bf16.msra.mxu1 %v2428_v51  ;;  %2096 = vmatprep.subr.bf16.mxu0 %v2429_v52  ;;  %v286_v51 = vld [vmem:[%s2672_s26 + $0x40] sm:$0xff]  ;;  %v288_v52 = vld [vmem:[%s2672_s26 + $0x50] sm:$0xff] }
  0x32   : > { %2118 = vmatprep.subr.bf16.mxu1 %v2430_v53  ;;  %v305_v53 = vpack.c.bf16 %v289_v50, %v289_v50 }
  0x34   : > { %2097 = vmatpush3.bf16.msra.mxu0 %v2431_v54  ;;  %v302_v54 = vpack.c.bf16 %v286_v51, %v286_v51  ;;  %v1674_v51 = vld [vmem:[%s3115_s3 + $0x60] sm:$0xff] }
  0x35   : > { %2119 = vmatpush3.bf16.msra.mxu1 %v2432_v55  ;;  %2098 = vmatprep.subr.bf16.mxu0 %v2433_v56  ;;  %v304_v55 = vpack.c.bf16 %v288_v52, %v288_v52  ;;  %v2481_v56 = vld [vmem:[%s3113_s1 + $0x340] sm:$0xff]   ;;  %v1675_v52 = vld [vmem:[%s3115_s3 + $0x68] sm:$0xff] }
  0x36   : > { %2120 = vmatprep.subr.bf16.mxu1 %v2434_v57  ;;  %v2482_v57 = vld [vmem:[%s3113_s1 + $0x3c0] sm:$0xff]  }
  0x38   : > { %2099 = vmatpush3.bf16.msra.mxu0 %v2435_v58  ;;  %v2483_v58 = vld [vmem:[%s3113_s1 + $0x300] sm:$0xff]  }
  0x39   : > { %2121 = vmatpush3.bf16.msra.mxu1 %v2436_v59  ;;  %2100 = vmatprep.subr.bf16.mxu0 %v2437_v60  ;;  %v2484_v59 = vld [vmem:[%s3113_s1 + $0x380] sm:$0xff]   ;;  %v2485_v60 = vld [vmem:[%s3113_s1 + $0x348] sm:$0xff]  }
  0x3a   : > { %2122 = vmatprep.subr.bf16.mxu1 %v2438_v61  ;;  %v2486_v61 = vld [vmem:[%s3113_s1 + $0x3c8] sm:$0xff]  }
  0x3c   : > { %2101 = vmatpush3.bf16.msra.mxu0 %v2439_v62  ;;  %v2487_v62 = vld [vmem:[%s3113_s1 + $0x308] sm:$0xff]  }
  0x3d   : > { %2123 = vmatpush3.bf16.msra.mxu1 %v2440_v63  ;;  %2102 = vmatprep.subr.bf16.mxu0 %v2441_v0  ;;  %v2488_v63 = vld [vmem:[%s3113_s1 + $0x388] sm:$0xff]   ;;  %v2489_v0 = vld [vmem:[%s3113_s1 + $0x350] sm:$0xff]  }
  0x3e   : > { %2124 = vmatprep.subr.bf16.mxu1 %v2442_v1  ;;  %v2490_v1 = vld [vmem:[%s3113_s1 + $0x3d0] sm:$0xff]  }
  0x40   : > { %2103 = vmatpush3.bf16.msra.mxu0 %v2443_v2  ;;  %v2491_v2 = vld [vmem:[%s3113_s1 + $0x310] sm:$0xff]  }
  0x41   : > { %2125 = vmatpush3.bf16.msra.mxu1 %v2444_v3  ;;  %2104 = vmatprep.subr.bf16.mxu0 %v2445_v4  ;;  %v2492_v3 = vld [vmem:[%s3113_s1 + $0x390] sm:$0xff]   ;;  %v2493_v4 = vld [vmem:[%s3113_s1 + $0x358] sm:$0xff]  }
  0x42   : > { %2126 = vmatprep.subr.bf16.mxu1 %v2446_v5  ;;  %v2494_v5 = vld [vmem:[%s3113_s1 + $0x3d8] sm:$0xff]  }
  0x44   : > { %2105 = vmatpush3.bf16.msra.mxu0 %v2447_v6  ;;  %v2495_v6 = vld [vmem:[%s3113_s1 + $0x318] sm:$0xff]  }
  0x45   : > { %2127 = vmatpush3.bf16.msra.mxu1 %v2448_v7  ;;  %2134 = vmatprep.subr.bf16.mxu0 %v2449_v16  ;;  %v2496_v7 = vld [vmem:[%s3113_s1 + $0x398] sm:$0xff]   ;;  %v2505_v16 = vld [vmem:[%s3113_s1 + $0x370] sm:$0xff]  }
  0x46   : > { %2156 = vmatprep.subr.bf16.mxu1 %v2450_v17  ;;  %v2506_v17 = vld [vmem:[%s3113_s1 + $0x3f0] sm:$0xff]  }
  0x47   : > { %1454 = vmatmul.mubr.bf16.vlgmr.msra.gmra.mrb[4].mxu0 %v298_v14  ;;  %v2503_v14 = vld [vmem:[%s3113_s1 + $0x328] sm:$0xff]  }
  0x48   : > { %1494 = vmatmul.mubr.bf16.vlgmr.msra.gmra.mrb[4].mxu1 %v300_v15  ;;  %2135 = vmatpush3.bf16.msra.mxu0 %v2451_v18  ;;  %v2504_v15 = vld [vmem:[%s3113_s1 + $0x3a8] sm:$0xff]   ;;  %v2507_v18 = vld [vmem:[%s3113_s1 + $0x330] sm:$0xff]  }
  0x49   : > { %2157 = vmatpush3.bf16.msra.mxu1 %v2452_v19  ;;  %2136 = vmatprep.subr.bf16.mxu0 %v2453_v20  ;;  %v2508_v19 = vld [vmem:[%s3113_s1 + $0x3b0] sm:$0xff]   ;;  %v2509_v20 = vld [vmem:[%s3113_s1 + $0x378] sm:$0xff]  }
  0x4a   : > { %2158 = vmatprep.subr.bf16.mxu1 %v2454_v21  ;;  %1533 = vmatprep.mubr.bf16.mxu0 %v303_v49  ;;  %v2510_v21 = vld [vmem:[%s3113_s1 + $0x3f8] sm:$0xff]  }
  0x4b   : > { %1573 = vmatprep.mubr.bf16.mxu1 %v305_v53  ;;  %v1673_v49 = vld [vmem:[%s3115_s3 + $0x58] sm:$0xff]  ;;  %v2345_v53 = vpack.c.bf16 %v1675_v52, %v1674_v51 }
  0x4c   : > { %2137 = vmatpush3.bf16.msra.mxu0 %v2455_v22  ;;  %v2511_v22 = vld [vmem:[%s3113_s1 + $0x338] sm:$0xff]   ;;  %v2342_v50 = vpack.c.bf16 %v1673_v49, %v1672_v48 }
  0x4d   : > { %2159 = vmatpush3.bf16.msra.mxu1 %v2456_v23  ;;  %2138 = vmatprep.subr.bf16.mxu0 %v2457_v24  ;;  %v2512_v23 = vld [vmem:[%s3113_s1 + $0x3b8] sm:$0xff]   ;;  %v291_v24 = vld [vmem:[%s2672_s26 + $0x68] sm:$0xff] }
  0x4e   : > { %2160 = vmatprep.subr.bf16.mxu1 %v2458_v25  ;;  %v293_v25 = vld [vmem:[%s2672_s26 + $0x78] sm:$0xff] }
  0x50   : > { %2139 = vmatpush3.bf16.msra.mxu0 %v2459_v26  ;;  %v290_v26 = vld [vmem:[%s2672_s26 + $0x60] sm:$0xff] }
  0x51   : > { %2161 = vmatpush3.bf16.msra.mxu1 %v2460_v27  ;;  %2140 = vmatprep.subr.bf16.mxu0 %v2461_v28  ;;  %v307_v27 = vpack.c.bf16 %v291_v24, %v291_v24  ;;  %v309_v28 = vpack.c.bf16 %v293_v25, %v293_v25 }
  0x52   : > { %2162 = vmatprep.subr.bf16.mxu1 %v2462_v29  ;;  %v306_v29 = vpack.c.bf16 %v290_v26, %v290_v26 }
  0x54   : > { %2141 = vmatpush3.bf16.msra.mxu0 %v2463_v30  ;;  %v292_v30 = vld [vmem:[%s2672_s26 + $0x70] sm:$0xff] }
  0x55   : > { %2163 = vmatpush3.bf16.msra.mxu1 %v2464_v31  ;;  %2142 = vmatprep.subr.bf16.mxu0 %v2465_v32  ;;  %v308_v31 = vpack.c.bf16 %v292_v30, %v292_v30  ;;  %v1662_v32 = vld [vmem:[%s3115_s3] sm:$0xff] }
  0x56   : > { %2164 = vmatprep.subr.bf16.mxu1 %v2466_v33  ;;  %v1663_v33 = vld [vmem:[%s3115_s3 + $0x8] sm:$0xff] }
  0x58   : > { %2143 = vmatpush3.bf16.msra.mxu0 %v2467_v34  ;;  %v1664_v34 = vld [vmem:[%s3115_s3 + $0x10] sm:$0xff] }
  0x59   : > { %2165 = vmatpush3.bf16.msra.mxu1 %v2468_v35  ;;  %2144 = vmatprep.subr.bf16.mxu0 %v2469_v36  ;;  %v2521_v35 = vmov 0.0|0.0   ;;  %v2327_v36 = vpack.c.bf16 %v1663_v33, %v1662_v32 }
  0x5a   : > { %2166 = vmatprep.subr.bf16.mxu1 %v2470_v37  ;;  %v1665_v37 = vld [vmem:[%s3115_s3 + $0x18] sm:$0xff] }
  0x5c   : > { %2145 = vmatpush3.bf16.msra.mxu0 %v2471_v38  ;;  %v2330_v38 = vpack.c.bf16 %v1665_v37, %v1664_v34 }
  0x5d   : > { %2167 = vmatpush3.bf16.msra.mxu1 %v2472_v39  ;;  %2146 = vmatprep.subr.bf16.mxu0 %v2473_v40  ;;  %v1666_v39 = vld [vmem:[%s3115_s3 + $0x20] sm:$0xff]  ;;  %v1667_v40 = vld [vmem:[%s3115_s3 + $0x28] sm:$0xff] }
  0x5e   : > { %2168 = vmatprep.subr.bf16.mxu1 %v2474_v41  ;;  %v2333_v41 = vpack.c.bf16 %v1667_v40, %v1666_v39 }
  0x60   : > { %2147 = vmatpush3.bf16.msra.mxu0 %v2475_v42  ;;  %v1668_v42 = vld [vmem:[%s3115_s3 + $0x30] sm:$0xff] }
  0x61   : > { %2169 = vmatpush3.bf16.msra.mxu1 %v2476_v43  ;;  %2148 = vmatprep.subr.bf16.mxu0 %v2477_v44  ;;  %v1669_v43 = vld [vmem:[%s3115_s3 + $0x38] sm:$0xff] }
  0x62   : > { %2170 = vmatprep.subr.bf16.mxu1 %v2478_v45  ;;  %v2336_v44 = vpack.c.bf16 %v1669_v43, %v1668_v42  ;;  %v1670_v45 = vld [vmem:[%s3115_s3 + $0x40] sm:$0xff] }
  0x64   : > { %2149 = vmatpush3.bf16.msra.mxu0 %v2479_v46  ;;  %v1671_v46 = vld [vmem:[%s3115_s3 + $0x48] sm:$0xff] }
  0x65   : > { %2171 = vmatpush3.bf16.msra.mxu1 %v2480_v47  ;;  %2178 = vmatprep.subr.bf16.mxu0 %v2481_v56  ;;  %v2339_v47 = vpack.c.bf16 %v1671_v46, %v1670_v45 }
  0x66   : > { %2200 = vmatprep.subr.bf16.mxu1 %v2482_v57  ;;  %v2523_v57 = vmov 0.0  }
  0x67   : > { %1534 = vmatmul.mubr.bf16.vlgmr.msra.gmra.mrb[8].mxu0 %v302_v54  ;;  %v1676_v54 = vld [vmem:[%s3115_s3 + $0x70] sm:$0xff] }
  0x68   : > { %1574 = vmatmul.mubr.bf16.vlgmr.msra.gmra.mrb[8].mxu1 %v304_v55  ;;  %2179 = vmatpush3.bf16.msra.mxu0 %v2483_v58  ;;  %v1677_v55 = vld [vmem:[%s3115_s3 + $0x78] sm:$0xff]  ;;  %v1756_v58 = vld [vmem:[%s3117_s5] sm:$0xff] }
  0x69   : > { %2201 = vmatpush3.bf16.msra.mxu1 %v2484_v59  ;;  %2180 = vmatprep.subr.bf16.mxu0 %v2485_v60  ;;  %v2348_v56 = vpack.c.bf16 %v1677_v55, %v1676_v54  ;;  %v1757_v59 = vld [vmem:[%s3117_s5 + $0x8] sm:$0xff]  ;;  %v1758_v60 = vld [vmem:[%s3117_s5 + $0x10] sm:$0xff] }
  0x6a   : > { %2202 = vmatprep.subr.bf16.mxu1 %v2486_v61  ;;  %1613 = vmatprep.mubr.bf16.mxu0 %v307_v27  ;;  %v2351_v61 = vpack.c.bf16 %v1757_v59, %v1756_v58 }
  0x6b   : > { %1653 = vmatprep.mubr.bf16.mxu1 %v309_v28 }
  0x6c   : > { %2181 = vmatpush3.bf16.msra.mxu0 %v2487_v62  ;;  %v1759_v62 = vld [vmem:[%s3117_s5 + $0x18] sm:$0xff] }
  0x6d   : > { %2203 = vmatpush3.bf16.msra.mxu1 %v2488_v63  ;;  %2182 = vmatprep.subr.bf16.mxu0 %v2489_v0  ;;  %v2354_v63 = vpack.c.bf16 %v1759_v62, %v1758_v60  ;;  %v1760_v0 = vld [vmem:[%s3117_s5 + $0x20] sm:$0xff] }
  0x6e   : > { %2204 = vmatprep.subr.bf16.mxu1 %v2490_v1  ;;  %v1761_v1 = vld [vmem:[%s3117_s5 + $0x28] sm:$0xff] }
  0x70   : > { %2183 = vmatpush3.bf16.msra.mxu0 %v2491_v2  ;;  %v2357_v2 = vpack.c.bf16 %v1761_v1, %v1760_v0  ;;  %v1770_v1 = vld [vmem:[%s3117_s5 + $0x70] sm:$0xff] }
  0x71   : > { %2205 = vmatpush3.bf16.msra.mxu1 %v2492_v3  ;;  %2184 = vmatprep.subr.bf16.mxu0 %v2493_v4  ;;  %v1762_v3 = vld [vmem:[%s3117_s5 + $0x30] sm:$0xff]  ;;  %v1763_v4 = vld [vmem:[%s3117_s5 + $0x38] sm:$0xff] }
  0x72   : > { %2206 = vmatprep.subr.bf16.mxu1 %v2494_v5  ;;  %v2360_v5 = vpack.c.bf16 %v1763_v4, %v1762_v3  ;;  %v2041_v4 = vld [vmem:[%s3116_s4] ss:$0 sm:$0xff] }
  0x74   : > { %2185 = vmatpush3.bf16.msra.mxu0 %v2495_v6  ;;  %v1764_v6 = vld [vmem:[%s3117_s5 + $0x40] sm:$0xff] }
  0x75   : > { %2207 = vmatpush3.bf16.msra.mxu1 %v2496_v7  ;;  %2186 = vmatprep.subr.bf16.mxu0 %v2497_v8  ;;  %v1765_v7 = vld [vmem:[%s3117_s5 + $0x48] sm:$0xff] }
  0x76   : > { %2208 = vmatprep.subr.bf16.mxu1 %v2498_v9  ;;  %v2363_v8 = vpack.c.bf16 %v1765_v7, %v1764_v6  ;;  %v1766_v9 = vld [vmem:[%s3117_s5 + $0x50] sm:$0xff] }
  0x78   : > { %2187 = vmatpush3.bf16.msra.mxu0 %v2499_v10  ;;  %v1767_v10 = vld [vmem:[%s3117_s5 + $0x58] sm:$0xff] }
  0x79   : > { %2209 = vmatpush3.bf16.msra.mxu1 %v2500_v11  ;;  %2188 = vmatprep.subr.bf16.mxu0 %v2501_v12 }
  0x7a   : > { %2210 = vmatprep.subr.bf16.mxu1 %v2502_v13  ;;  %v1912_v13 = vld [vmem:[%s3114_s2] ss:$0 sm:$0xff] }
  0x7c   : > { %2189 = vmatpush3.bf16.msra.mxu0 %v2503_v14 }
  0x7d   : > { %2211 = vmatpush3.bf16.msra.mxu1 %v2504_v15  ;;  %2190 = vmatprep.subr.bf16.mxu0 %v2505_v16  ;;  %v2366_v16 = vpack.c.bf16 %v1767_v10, %v1766_v9  ;;  %v2042_v9 = vld [vmem:[%s3118_s6] ss:$0 sm:$0xff] }
  0x7e   : > { %2212 = vmatprep.subr.bf16.mxu1 %v2506_v17 }
  0x80   : > { %2191 = vmatpush3.bf16.msra.mxu0 %v2507_v18 }
  0x81   : > { %2213 = vmatpush3.bf16.msra.mxu1 %v2508_v19  ;;  %2192 = vmatprep.subr.bf16.mxu0 %v2509_v20 }
  0x82   : > { %2214 = vmatprep.subr.bf16.mxu1 %v2510_v21  ;;  %v1768_v21 = vld [vmem:[%s3117_s5 + $0x60] sm:$0xff] }
  0x84   : > { %2193 = vmatpush3.bf16.msra.mxu0 %v2511_v22  ;;  %v1769_v22 = vld [vmem:[%s3117_s5 + $0x68] sm:$0xff] }
  0x85   : > { %2215 = vmatpush3.bf16.msra.mxu1 %v2512_v23  ;;  %2326 = vmatprep.subr.bf16.mxu0 %v2521_v35  ;;  %v2369_v26 = vpack.c.bf16 %v1769_v22, %v1768_v21 }
  0x86   : > { %2350 = vmatprep.subr.bf16.mxu1 %v2521_v35 }
  0x87   : > { %1614 = vmatmul.mubr.bf16.vlgmr.msra.gmra.mrb[12].mxu0 %v306_v29 }
  0x88   : > { %1654 = vmatmul.mubr.bf16.vlgmr.msra.gmra.mrb[12].mxu1 %v308_v31  ;;  %2328 = vmatpush3.bf16.msra.mxu0 %v2327_v36 }
  0x89   : > { %2329 = vmatprep.subr.bf16.mxu0 %v2521_v35  ;;  %2288 = vmatprep.mubr.msk.f32.mxu0 %vm2522_vm0, %v2523_v57 }
  0x8a   : > { %2323 = vmatprep.mubr.msk.f32.mxu1 %vm2522_vm0, %v2523_v57  ;;  %2352 = vmatpush3.bf16.msra.mxu1 %v2351_v61 }
  0x8b   : > { %2353 = vmatprep.subr.bf16.mxu1 %v2521_v35 }
  0x8c   : > { %2331 = vmatpush3.bf16.msra.mxu0 %v2330_v38 }
  0x8d   : > { %2332 = vmatprep.subr.bf16.mxu0 %v2521_v35 }
  0x8e   : > { %2355 = vmatpush3.bf16.msra.mxu1 %v2354_v63 }
  0x8f   : > { %2356 = vmatprep.subr.bf16.mxu1 %v2521_v35 }
  0x90   : > { %2334 = vmatpush3.bf16.msra.mxu0 %v2333_v41 }
  0x91   : > { %2335 = vmatprep.subr.bf16.mxu0 %v2521_v35 }
  0x92   : > { %2358 = vmatpush3.bf16.msra.mxu1 %v2357_v2  ;;  %v1771_v2 = vld [vmem:[%s3117_s5 + $0x78] sm:$0xff] }
  0x93   : > { %2359 = vmatprep.subr.bf16.mxu1 %v2521_v35  ;;  %v2372_v3 = vpack.c.bf16 %v1771_v2, %v1770_v1 }
  0x94   : > { %2337 = vmatpush3.bf16.msra.mxu0 %v2336_v44 }
  0x95   : > { %2338 = vmatprep.subr.bf16.mxu0 %v2521_v35 }
  0x96   : > { %2361 = vmatpush3.bf16.msra.mxu1 %v2360_v5 }
  0x97   : > { %2362 = vmatprep.subr.bf16.mxu1 %v2521_v35 }
  0x98   : > { %2340 = vmatpush3.bf16.msra.mxu0 %v2339_v47 }
  0x99   : > { %2341 = vmatprep.subr.bf16.mxu0 %v2521_v35 }
  0x9a   : > { %2364 = vmatpush3.bf16.msra.mxu1 %v2363_v8 }
  0x9b   : > { %2365 = vmatprep.subr.bf16.mxu1 %v2521_v35 }
  0x9c   : > { %2343 = vmatpush3.bf16.msra.mxu0 %v2342_v50 }
  0x9d   : > { %2344 = vmatprep.subr.bf16.mxu0 %v2521_v35 }
  0x9e   : > { %2367 = vmatpush3.bf16.msra.mxu1 %v2366_v16 }
  0x9f   : > { %2368 = vmatprep.subr.bf16.mxu1 %v2521_v35 }
  0xa0   : > { %2346 = vmatpush3.bf16.msra.mxu0 %v2345_v53 }
  0xa1   : > { %2347 = vmatprep.subr.bf16.mxu0 %v2521_v35 }
  0xa2   : > { %2370 = vmatpush3.bf16.msra.mxu1 %v2369_v26 }
  0xa3   : > { %2371 = vmatprep.subr.bf16.mxu1 %v2521_v35 }
  0xa4   : > { %2349 = vmatpush3.bf16.msra.mxu0 %v2348_v56 }
  0xa6   : > { %2373 = vmatpush3.bf16.msra.mxu1 %v2372_v3 }
  0xfa   : > { %v2062_v11 = vpop.f32.mrb[0].mxu0 }
  0xfb   : > { %v2084_v12 = vpop.f32.mrb[0].mxu1  ;;  %v2063_v14 = vpop.f32.mrb[1].mxu0 }
  0xfc   : > { %v2085_v15 = vpop.f32.mrb[1].mxu1  ;;  %v2064_v17 = vadd.f32 %v2063_v14, %v2062_v11  ;;  %v2065_v19 = vpop.f32.mrb[2].mxu0 }
  0xfd   : > { %v2086_v18 = vadd.f32 %v2085_v15, %v2084_v12  ;;  %v2087_v20 = vpop.f32.mrb[2].mxu1  ;;  %v2066_v23 = vpop.f32.mrb[3].mxu0 }
  0xfe   : > { %v2088_v24 = vpop.f32.mrb[3].mxu1  ;;  %v1376_v25 = vadd.f32 %v2064_v17, %v1912_v13 }
 0x100   : > { %v1416_v27 = vadd.f32 %v2086_v18, %v1376_v25 }
 0x11a   : > { %v2106_v28 = vpop.f32.mrb[4].mxu0 }
 0x11b   : > { %v2128_v29 = vpop.f32.mrb[4].mxu1  ;;  %v2107_v30 = vpop.f32.mrb[5].mxu0 }
 0x11c   : > { %v2108_v31 = vadd.f32 %v2107_v30, %v2106_v28  ;;  %v2129_v32 = vpop.f32.mrb[5].mxu1  ;;  %v2109_v33 = vpop.f32.mrb[6].mxu0 }
 0x11d   : > { %v2130_v34 = vadd.f32 %v2129_v32, %v2128_v29  ;;  %v2131_v36 = vpop.f32.mrb[6].mxu1  ;;  %v2110_v37 = vpop.f32.mrb[7].mxu0 }
 0x11e   : > { %v1456_v38 = vadd.f32 %v2108_v31, %v1416_v27  ;;  %v2132_v39 = vpop.f32.mrb[7].mxu1 }
 0x120   : > { %v1496_v40 = vadd.f32 %v2130_v34, %v1456_v38 }
 0x13a   : > { %v2150_v41 = vpop.f32.mrb[8].mxu0 }
 0x13b   : > { %v2172_v42 = vpop.f32.mrb[8].mxu1  ;;  %v2151_v43 = vpop.f32.mrb[9].mxu0 }
 0x13c   : > { %v2152_v44 = vadd.f32 %v2151_v43, %v2150_v41  ;;  %v2173_v45 = vpop.f32.mrb[9].mxu1  ;;  %v2153_v46 = vpop.f32.mrb[10].mxu0 }
 0x13d   : > { %v2174_v47 = vadd.f32 %v2173_v45, %v2172_v42  ;;  %v2175_v35 = vpop.f32.mrb[10].mxu1  ;;  %v2154_v48 = vpop.f32.mrb[11].mxu0 }
 0x13e   : > { %v1536_v49 = vadd.f32 %v2152_v44, %v1496_v40  ;;  %v2176_v50 = vpop.f32.mrb[11].mxu1 }
 0x140   : > { %v1576_v51 = vadd.f32 %v2174_v47, %v1536_v49 }
 0x15a   : > { %v2194_v52 = vpop.f32.mrb[12].mxu0 }
 0x15b   : > { %v2216_v53 = vpop.f32.mrb[12].mxu1  ;;  %v2195_v54 = vpop.f32.mrb[13].mxu0 }
 0x15c   : > { %v2217_v55 = vpop.f32.mrb[13].mxu1  ;;  %v2196_v56 = vadd.f32 %v2195_v54, %v2194_v52  ;;  %v2197_v58 = vpop.f32.mrb[14].mxu0 }
 0x15d   : > { %v2218_v57 = vadd.f32 %v2217_v55, %v2216_v53  ;;  %v2219_v59 = vpop.f32.mrb[14].mxu1  ;;  %v2198_v60 = vpop.f32.mrb[15].mxu0 }
 0x15e   : > { %v2220_v61 = vpop.f32.mrb[15].mxu1  ;;  %v1616_v62 = vadd.f32 %v2196_v56, %v1576_v51 }
 0x160   : > { %v1656_v63 = vadd.f32 %v2218_v57, %v1616_v62 }
 0x162   : > { %v1661_v0 = vmax.f32 %v1656_v63, 0.0 }
 0x164   : > { %2289 = vmatmul.mubr.f32.vlgmr.msra.gmra.mrb[16].mxu0 %v1661_v0 }
 0x237   : > { %v1751_v5 = vpop.f32.mrb[16].mxu0 }
 0x238   : > { %v1752_v6 = vadd.f32 %v2041_v4, %v1751_v5  ;;  %v2290_v7 = vpop.f32.mrb[17].mxu0 }
 0x23a   : > { %v1755_v8 = vmax.f32 %v1752_v6, 0.0 }
 0x23c   : > { %2324 = vmatmul.mubr.f32.vlgmr.msra.gmra.mrb[16].mxu1 %v1755_v8 }
 0x30f   : > { %v1845_v10 = vpop.f32.mrb[16].mxu1 }
 0x310   : > { %v1846_v11 = vadd.f32 %v2042_v9, %v1845_v10  ;;  %v2325_v12 = vpop.f32.mrb[17].mxu1 }
 0x312   : > { %1850 = vst.msk [vmem:[%s276_s9] sm:$0xff] %vm1849_vm1, %v1846_v11 }
 0x313 PF: > { %s17_s24 = sadd.s32 1, %s2519_s24  }
 0x314   : > { %p14_p4 = scmp.ge.s32.totalorder %s17_s24, 4  }
 0x316   :  { %16 = sbr.rel (!%p14_p4) target bundleno = 1 (0x1), region = 78 }

</bundles_post_ra>
